<compile_context>
chip_gen: v5e
topology: v5e:2x2
jax: 0.10.0
libtpu: 0.0.40
codegen_flags: <defaults>
</compile_context>

<pallas_src>
import jax
import jax.numpy as jnp
from jax.experimental import pallas as pl
from jax.experimental.pallas import tpu as pltpu


def _round_up(x, m):
    return ((x + m - 1) // m) * m


def mlp_kernel(x_ref, w1_ref, b1_ref, w2_ref, b2_ref, o_ref):
    # First linear: bf16 MXU inputs, f32 accumulation; bias + ReLU in f32.
    h = jnp.dot(x_ref[...], w1_ref[...], preferred_element_type=jnp.float32)
    h = jnp.maximum(h + b1_ref[...], 0.0)
    # Second linear: cast activations to the weight dtype for the MXU,
    # accumulate in f32, add bias, store lane-dense (out_pad = 128).
    out = jnp.dot(h.astype(w2_ref.dtype), w2_ref[...],
                  preferred_element_type=jnp.float32)
    o_ref[...] = (out + b2_ref[...]).astype(o_ref.dtype)


def mlp_forward(x, w1, b1, w2, b2, *, block_m=256, use_bf16=True):
    """x: (N, C, H, W) float32.
    w1: (in_dim, hidden), b1: (hidden,)/(1, hidden),
    w2: (hidden, out_dim), b2: (out_dim,)/(1, out_dim).
    Returns (N, out_dim) float32."""
    n = x.shape[0]
    in_dim, hidden = w1.shape
    out_dim = w2.shape[1]
    x2d = x.reshape(n, in_dim)           # same semantics as x.view(-1, in_dim)
    b1 = b1.reshape(1, hidden)
    b2 = b2.reshape(1, out_dim)

    # Lane-dense (multiple-of-128) padding on every lane axis.
    in_pad = _round_up(in_dim, 128)
    hid_pad = _round_up(hidden, 128)
    out_pad = _round_up(out_dim, 128)

    # Batch tile: multiple of 16 (bf16 sublane packing); pad N so it divides.
    tm = block_m if n >= block_m else _round_up(max(n, 1), 16)
    n_pad = _round_up(n, tm)

    mm_dtype = jnp.bfloat16 if use_bf16 else x.dtype

    # Zero-padding is semantics-preserving: padded x columns meet zero w1 rows,
    # padded hidden columns are ReLU(0)=0 and meet zero w2 rows, padded output
    # columns are sliced off below.
    x_p = jnp.zeros((n_pad, in_pad), mm_dtype).at[:n, :in_dim].set(
        x2d.astype(mm_dtype))
    w1_p = jnp.zeros((in_pad, hid_pad), mm_dtype).at[:in_dim, :hidden].set(
        w1.astype(mm_dtype))
    b1_p = jnp.zeros((1, hid_pad), jnp.float32).at[:, :hidden].set(
        b1.astype(jnp.float32))
    w2_p = jnp.zeros((hid_pad, out_pad), mm_dtype).at[:hidden, :out_dim].set(
        w2.astype(mm_dtype))
    b2_p = jnp.zeros((1, out_pad), jnp.float32).at[:, :out_dim].set(
        b2.astype(jnp.float32))

    out = pl.pallas_call(
        mlp_kernel,
        out_shape=jax.ShapeDtypeStruct((n_pad, out_pad), jnp.float32),
        grid_spec=pltpu.PrefetchScalarGridSpec(
            num_scalar_prefetch=0,
            grid=(n_pad // tm,),
            in_specs=[
                pl.BlockSpec((tm, in_pad), lambda i: (i, 0)),        # x tile
                pl.BlockSpec((in_pad, hid_pad), lambda i: (0, 0)),   # w1 resident
                pl.BlockSpec((1, hid_pad), lambda i: (0, 0)),        # b1 resident
                pl.BlockSpec((hid_pad, out_pad), lambda i: (0, 0)),  # w2 resident
                pl.BlockSpec((1, out_pad), lambda i: (0, 0)),        # b2 resident
            ],
            out_specs=pl.BlockSpec((tm, out_pad), lambda i: (i, 0)),
        ),
        compiler_params=pltpu.CompilerParams(
            # Batch tiles are independent -> shard across TensorCores (v7x).
            dimension_semantics=("parallel",),
        ),
    )(x_p, w1_p, b1_p, w2_p, b2_p)

    return out[:n, :out_dim]


if __name__ == "__main__":
    # Small shapes consistent with the module: in_channel=1, img_sz=16,
    # hidden_dim=32, out_dim=10, batch=2.
    batch, in_channel, img_sz = 2, 1, 16
    hidden_dim, out_dim = 32, 10
    in_dim = in_channel * img_sz * img_sz

    key = jax.random.PRNGKey(0)
    kx, kw1, kb1, kw2, kb2 = jax.random.split(key, 5)

    x = jax.random.normal(kx, (batch, in_channel, img_sz, img_sz), dtype=jnp.float32)

    # PyTorch nn.Linear weights are (out, in); stored here pre-transposed
    # as (in, out) for the kernel.
    w1 = (jax.random.normal(kw1, (in_dim, hidden_dim), dtype=jnp.float32)
          * (1.0 / jnp.sqrt(in_dim)))
    b1 = jax.random.normal(kb1, (1, hidden_dim), dtype=jnp.float32) * 0.01
    w2 = (jax.random.normal(kw2, (hidden_dim, out_dim), dtype=jnp.float32)
          * (1.0 / jnp.sqrt(hidden_dim)))
    b2 = jax.random.normal(kb2, (1, out_dim), dtype=jnp.float32) * 0.01

    out = mlp_forward(x, w1, b1, w2, b2)
    out = jax.block_until_ready(out)
    assert out.shape == (batch, out_dim)

    # Reference with the same bf16-input / f32-accumulate math as the kernel.
    x_bf = x.reshape(batch, in_dim).astype(jnp.bfloat16)
    h_ref = jnp.maximum(
        jnp.dot(x_bf, w1.astype(jnp.bfloat16),
                preferred_element_type=jnp.float32) + b1, 0.0)
    ref = jnp.dot(h_ref.astype(jnp.bfloat16), w2.astype(jnp.bfloat16),
                  preferred_element_type=jnp.float32) + b2
    assert jnp.allclose(out, ref, atol=1e-2, rtol=1e-2)

    # Sanity check against full-f32 math (bf16 inputs -> loose tolerance).
    ref_f32 = jnp.maximum(x.reshape(batch, in_dim) @ w1 + b1, 0.0) @ w2 + b2
    assert jnp.allclose(out, ref_f32, atol=5e-2, rtol=5e-2)

    print("KERNEL_OK")
</pallas_src>

<mosaic_0001>
module attributes {stable_mosaic.version = 11 : i64} {
  func.func @mlp_kernel(%arg0: i32, %arg1: memref<16x256xbf16, #tpu.memory_space<vmem>>, %arg2: memref<256x128xbf16, #tpu.memory_space<vmem>>, %arg3: memref<1x128xf32, #tpu.memory_space<vmem>>, %arg4: memref<128x128xbf16, #tpu.memory_space<vmem>>, %arg5: memref<1x128xf32, #tpu.memory_space<vmem>>, %arg6: memref<16x128xf32, #tpu.memory_space<vmem>>) attributes {dimension_semantics = [#tpu.dimension_semantics<parallel>], iteration_bounds = array<i64: 1>, scalar_prefetch = 0 : i64, scratch_operands = 0 : i64, tpu.core_type = #tpu.core_type<tc>, window_params = [{transform_indices = @transform_0, window_bounds = array<i64: 16, 256>}, {pipeline_mode = #tpu.pipeline_mode<synchronous>, transform_indices = @transform_1, window_bounds = array<i64: 256, 128>}, {pipeline_mode = #tpu.pipeline_mode<synchronous>, transform_indices = @transform_2, window_bounds = array<i64: 1, 128>}, {pipeline_mode = #tpu.pipeline_mode<synchronous>, transform_indices = @transform_3, window_bounds = array<i64: 128, 128>}, {pipeline_mode = #tpu.pipeline_mode<synchronous>, transform_indices = @transform_4, window_bounds = array<i64: 1, 128>}, {transform_indices = @transform_5, window_bounds = array<i64: 16, 128>}]} {
    %c0 = arith.constant 0 : index
    %c0_0 = arith.constant 0 : index
    %0 = vector.load %arg1[%c0, %c0_0] : memref<16x256xbf16, #tpu.memory_space<vmem>>, vector<16x256xbf16>
    %c0_1 = arith.constant 0 : index
    %c0_2 = arith.constant 0 : index
    %1 = vector.load %arg2[%c0_1, %c0_2] : memref<256x128xbf16, #tpu.memory_space<vmem>>, vector<256x128xbf16>
    %cst = arith.constant dense<0.000000e+00> : vector<16x128xf32>
    %2 = tpu.matmul %0, %1, %cst {dimension_numbers = #tpu.dot_dimension_numbers<[1], [0], [0], [1], [0, 0, 1, 1], [], []>} : vector<16x256xbf16>, vector<256x128xbf16>, vector<16x128xf32> -> vector<16x128xf32>
    %c0_3 = arith.constant 0 : index
    %c0_4 = arith.constant 0 : index
    %3 = vector.load %arg3[%c0_3, %c0_4] : memref<1x128xf32, #tpu.memory_space<vmem>>, vector<1x128xf32>
    %4 = vector.broadcast %3 : vector<1x128xf32> to vector<16x128xf32>
    %5 = arith.addf %2, %4 : vector<16x128xf32>
    %cst_5 = arith.constant 0.000000e+00 : f32
    %6 = vector.broadcast %cst_5 : f32 to vector<16x128xf32>
    %7 = arith.maximumf %5, %6 : vector<16x128xf32>
    %8 = arith.truncf %7 : vector<16x128xf32> to vector<16x128xbf16>
    %c0_6 = arith.constant 0 : index
    %c0_7 = arith.constant 0 : index
    %9 = vector.load %arg4[%c0_6, %c0_7] : memref<128x128xbf16, #tpu.memory_space<vmem>>, vector<128x128xbf16>
    %cst_8 = arith.constant dense<0.000000e+00> : vector<16x128xf32>
    %10 = tpu.matmul %8, %9, %cst_8 {dimension_numbers = #tpu.dot_dimension_numbers<[1], [0], [0], [1], [0, 0, 1, 1], [], []>} : vector<16x128xbf16>, vector<128x128xbf16>, vector<16x128xf32> -> vector<16x128xf32>
    %c0_9 = arith.constant 0 : index
    %c0_10 = arith.constant 0 : index
    %11 = vector.load %arg5[%c0_9, %c0_10] : memref<1x128xf32, #tpu.memory_space<vmem>>, vector<1x128xf32>
    %12 = vector.broadcast %11 : vector<1x128xf32> to vector<16x128xf32>
    %13 = arith.addf %10, %12 : vector<16x128xf32>
    %c0_11 = arith.constant 0 : index
    %c0_12 = arith.constant 0 : index
    %14 = vector.load %arg6[%c0_11, %c0_12] : memref<16x128xf32, #tpu.memory_space<vmem>>, vector<16x128xf32>
    tpu.vector_store %arg6[%c0_11, %c0_12], %13 {strides = array<i32>} : memref<16x128xf32, #tpu.memory_space<vmem>>, vector<16x128xf32>,
    return
  }
  func.func @transform_0(%arg0: i32) -> (i32, i32) {
    %c0_i32 = arith.constant 0 : i32
    %c0_i32_0 = arith.constant 0 : i32
    return %arg0, %c0_i32 : i32, i32
  }
  func.func @transform_1(%arg0: i32) -> (i32, i32) {
    %c0_i32 = arith.constant 0 : i32
    %c0_i32_0 = arith.constant 0 : i32
    %c0_i32_1 = arith.constant 0 : i32
    return %c0_i32, %c0_i32_0 : i32, i32
  }
  func.func @transform_2(%arg0: i32) -> (i32, i32) {
    %c0_i32 = arith.constant 0 : i32
    %c0_i32_0 = arith.constant 0 : i32
    %c0_i32_1 = arith.constant 0 : i32
    return %c0_i32, %c0_i32_0 : i32, i32
  }
  func.func @transform_3(%arg0: i32) -> (i32, i32) {
    %c0_i32 = arith.constant 0 : i32
    %c0_i32_0 = arith.constant 0 : i32
    %c0_i32_1 = arith.constant 0 : i32
    return %c0_i32, %c0_i32_0 : i32, i32
  }
  func.func @transform_4(%arg0: i32) -> (i32, i32) {
    %c0_i32 = arith.constant 0 : i32
    %c0_i32_0 = arith.constant 0 : i32
    %c0_i32_1 = arith.constant 0 : i32
    return %c0_i32, %c0_i32_0 : i32, i32
  }
  func.func @transform_5(%arg0: i32) -> (i32, i32) {
    %c0_i32 = arith.constant 0 : i32
    %c0_i32_0 = arith.constant 0 : i32
    return %arg0, %c0_i32 : i32, i32
  }
}

</mosaic_0001>

<bundles_post_ra>
// kernel: tpu_custom_call.1
= control target key start
LH: loop header
LB: loop body
LE: loop exit
PB: predicated region body
PF: predicated region fallthrough
CT: control target
= control target key end

     0   :  { %10 = vsyncpa [#allocation3], 0  ;;  %s651_s0 = inlined_call_operand.hbm [shape: bf16[16,256], index: 0, kind: input, shape index: {}]   ;;  %s652_s1 = inlined_call_operand.hbm [shape: bf16[256,128], index: 1, kind: input, shape index: {}]   ;;  %s653_s2 = inlined_call_operand.vmem [shape: f32[1,128], index: 2, kind: input, shape index: {}]   ;;  %s654_s3 = inlined_call_operand.hbm [shape: bf16[128,128], index: 3, kind: input, shape index: {}]   ;;  %s655_s4 = inlined_call_operand.vmem [shape: f32[1,128], index: 4, kind: input, shape index: {}]   ;;  %s656_s5 = inlined_call_operand.hbm [shape: f32[16,128], index: 5, kind: output, shape index: {}]  }
   0x1   :  { %11 = vsyncpa [#allocation6], 0  ;;  %s30_s20 = sshll.u32 %s652_s1, 4  ;;  %s31_s20 = int_to_ptr.hbm [resolvable:$true] %s30_s20 }
   0x2   :  { %12 = vsyncpa [#allocation4], 0  ;;  %s589_s21 = smov [#allocation5]   ;;  %s17_s25 = sshll.u32 %s651_s0, 4  ;;  %s18_s25 = int_to_ptr.hbm [resolvable:$true] %s17_s25 }
   0x3   :  { %s32_s22 = sshll.u32 %s589_s21, 4  ;;  %s590_s26 = smov 64   ;;  %s33_s22 = int_to_ptr.vmem [resolvable:$true] %s32_s22 }
   0x4   :  { %s591_s27 = smov 4   ;;  %s592_s28 = smov [#allocation2]  }
   0x5   :  { %38 = dma.hbm_to_vmem [thread:$0]  %s31_s20, 2048, %s33_s22, [#allocation6], %s590_s26, %s590_s26, %s591_s27  }
   0x6   :  { %s19_s29 = sshll.u32 %s592_s28, 4  ;;  %s593_s30 = smov 128   ;;  %s20_s29 = int_to_ptr.vmem [resolvable:$true] %s19_s29 }
   0x7   :  { %s594_s6 = smov 8   ;;  %s45_s8 = sshll.u32 %s654_s3, 4  ;;  %s46_s8 = int_to_ptr.hbm [resolvable:$true] %s45_s8 }
   0x8   :  { %25 = dma.hbm_to_vmem [thread:$0]  %s18_s25, 256, %s20_s29, [#allocation3], %s593_s30, %s593_s30, %s594_s6  }
   0x9   :  { %s595_s9 = smov [#allocation7]  }
   0xa   :  { %s47_s0 = sshll.u32 %s595_s9, 4  ;;  %s48_s0 = int_to_ptr.vmem [resolvable:$true] %s47_s0 }
   0xb   :  { %53 = dma.hbm_to_vmem [thread:$0]  %s46_s8, 1024, %s48_s0, [#allocation6], %s590_s26, %s590_s26, %s591_s27  }
   0xc   :  { %583 = dma.done.wait [#allocation3], 256  }
   0xd   :  { %584 = vsyncadd [#allocation3], 4294967040 }
   0xe   :  { %585 = dma.done.wait [#allocation6], 3072  }
   0xf   :  { %586 = vsyncadd [#allocation6], 4294964224  ;;  %v460_v0 = vld [vmem:[#allocation5 + $0x38] sm:$0xff]  ;;  %v459_v2 = vld [vmem:[#allocation5 + $0x30] sm:$0xff]  ;;  %s596_s13 = smov [#allocation8]   ;;  %s333_s16 = sshll.u32 %s656_s5, 4  ;;  %s334_s16 = int_to_ptr.hbm [resolvable:$true] %s333_s16 }
  0x10   :  { %v468_v1 = vld [vmem:[#allocation5 + $0x78] sm:$0xff]  ;;  %212 = vmatpush.bf16.msra.mxu0 %v460_v0  ;;  %v467_v3 = vld [vmem:[#allocation5 + $0x70] sm:$0xff]  ;;  %v458_v4 = vld [vmem:[#allocation5 + $0x28] sm:$0xff]  ;;  %s331_s14 = sshll.u32 %s596_s13, 4  ;;  %s332_s14 = int_to_ptr.vmem [resolvable:$true] %s331_s14 }
  0x11   :  { %226 = vmatpush.bf16.msra.mxu1 %v468_v1  ;;  %v466_v5 = vld [vmem:[#allocation5 + $0x68] sm:$0xff]  ;;  %v476_v6 = vld [vmem:[#allocation7 + $0x38] sm:$0xff]  ;;  %v475_v7 = vld [vmem:[#allocation7 + $0x30] sm:$0xff] }
  0x12   :  { %311 = vmatpush.bf16.msra.mxu2 %v476_v6  ;;  %v457_v8 = vld [vmem:[#allocation5 + $0x20] sm:$0xff]  ;;  %v474_v10 = vld [vmem:[#allocation7 + $0x28] sm:$0xff]  ;;  %v456_v11 = vld [vmem:[#allocation5 + $0x18] sm:$0xff] }
  0x13   :  { %v465_v9 = vld [vmem:[#allocation5 + $0x60] sm:$0xff]  ;;  %v464_v12 = vld [vmem:[#allocation5 + $0x58] sm:$0xff]  ;;  %v455_v14 = vld [vmem:[#allocation5 + $0x10] sm:$0xff] }
  0x14   :  { %213 = vmatpush.bf16.msra.mxu0 %v459_v2  ;;  %v473_v13 = vld [vmem:[#allocation7 + $0x20] sm:$0xff]  ;;  %v463_v15 = vld [vmem:[#allocation5 + $0x50] sm:$0xff]  ;;  %v454_v16 = vld [vmem:[#allocation5 + $0x8] sm:$0xff] }
  0x15   :  { %227 = vmatpush.bf16.msra.mxu1 %v467_v3  ;;  %v462_v17 = vld [vmem:[#allocation5 + $0x48] sm:$0xff]  ;;  %v453_v18 = vld [vmem:[#allocation5] sm:$0xff]  ;;  %v349_v20 = vld [vmem:[#allocation2] sm:$0xf] }
  0x16   :  { %312 = vmatpush.bf16.msra.mxu2 %v475_v7  ;;  %v461_v19 = vld [vmem:[#allocation5 + $0x40] sm:$0xff]  ;;  %v452_v21 = vld [vmem:[#allocation2 + $0x4] sm:$0xf0]  ;;  %v451_v22 = vld [vmem:[#allocation2 + $0x4] sm:$0xf] }
  0x17   :  { %v351_v23 = vld [vmem:[#allocation2 + $0x8] sm:$0xf0]  ;;  %v350_v24 = vor.u32 %v452_v21, %v349_v20  ;;  %v471_v27 = vld [vmem:[#allocation7 + $0x10] sm:$0xff]  ;;  %v470_v28 = vld [vmem:[#allocation7 + $0x8] sm:$0xff] }
  0x18   :  { %214 = vmatpush.bf16.msra.mxu0 %v458_v4  ;;  %v354_v25 = vor.u32 %v451_v22, %v351_v23  ;;  %v472_v26 = vld [vmem:[#allocation7 + $0x18] sm:$0xff]  ;;  %v469_v29 = vld [vmem:[#allocation7] sm:$0xff]  ;;  %v485_v32 = vld [vmem:[%s653_s2] ss:$0 sm:$0xff] }
  0x19   :  { %228 = vmatpush.bf16.msra.mxu1 %v466_v5  ;;  %v486_v42 = vld [vmem:[%s655_s4] ss:$0 sm:$0xff] }
  0x1a   :  { %313 = vmatpush.bf16.msra.mxu2 %v474_v10 }
  0x1c   :  { %215 = vmatpush.bf16.msra.mxu0 %v457_v8 }
  0x1d   :  { %229 = vmatpush.bf16.msra.mxu1 %v465_v9 }
  0x1e   :  { %314 = vmatpush.bf16.msra.mxu2 %v473_v13 }
  0x20   :  { %216 = vmatpush.bf16.msra.mxu0 %v456_v11 }
  0x21   :  { %230 = vmatpush.bf16.msra.mxu1 %v464_v12 }
  0x22   :  { %315 = vmatpush.bf16.msra.mxu2 %v472_v26 }
  0x24   :  { %217 = vmatpush.bf16.msra.mxu0 %v455_v14 }
  0x25   :  { %231 = vmatpush.bf16.msra.mxu1 %v463_v15 }
  0x26   :  { %316 = vmatpush.bf16.msra.mxu2 %v471_v27 }
  0x28   :  { %218 = vmatpush.bf16.msra.mxu0 %v454_v16 }
  0x29   :  { %232 = vmatpush.bf16.msra.mxu1 %v462_v17 }
  0x2a   :  { %317 = vmatpush.bf16.msra.mxu2 %v470_v28 }
  0x2c   :  { %219 = vmatpush.bf16.msra.mxu0 %v453_v18 }
  0x2d   :  { %233 = vmatpush.bf16.msra.mxu1 %v461_v19 }
  0x2e   :  { %318 = vmatpush.bf16.msra.mxu2 %v469_v29 }
  0x2f   :  { %220 = vmatmul.bf16.vlgmr.msra.gmra.mxu0 %v350_v24 }
  0x30   :  { %234 = vmatmul.bf16.vlgmr.msra.gmra.mxu1 %v354_v25 }
  0xac   :  { %v221_v30 = vpop.f32.mrf.mxu0 }
  0xad   :  { %v235_v31 = vpop.f32.mrf.mxu1  ;;  %v222_v33 = vadd.f32 %v485_v32, %v221_v30 }
  0xaf   :  { %v236_v35 = vadd.f32 %v235_v31, %v222_v33 }
  0xb1   :  { %v240_v39 = vmax.f32 %v236_v35, 0.0 }
  0xb4   :  { %v223_v34 = vpop.f32.mrf.mxu0 }
  0xb5   :  { %v224_v36 = vadd.f32 %v485_v32, %v223_v34  ;;  %v237_v37 = vpop.f32.mrf.mxu1 }
  0xb7   :  { %v238_v38 = vadd.f32 %v237_v37, %v224_v36 }
  0xb9   :  { %v241_v40 = vmax.f32 %v238_v38, 0.0 }
  0xbb   :  { %v242_v41 = vpack.c.bf16 %v241_v40, %v240_v39 }
  0xbd   :  { %319 = vmatmul.bf16.vlgmr.msra.gmra.mxu2 %v242_v41 }
 0x140   :  { %v320_v43 = vpop.f32.mrf.mxu2 }
 0x141   :  { %v321_v44 = vadd.f32 %v486_v42, %v320_v43 }
 0x143   :  { %325 = vst [vmem:[#allocation8] sm:$0xff] %v321_v44 }
 0x148   :  { %v322_v45 = vpop.f32.mrf.mxu2 }
 0x149   :  { %v323_v46 = vadd.f32 %v486_v42, %v322_v45 }
 0x14b   :  { %326 = vst [vmem:[#allocation8 + $0x8] sm:$0xff] %v323_v46 }
 0x14c   :  { %339 = dma.vmem_to_hbm [thread:$0]  %s332_s14, 256, %s334_s16, [#allocation4], %s593_s30, %s593_s30, %s594_s6  }
 0x14d   :  { %587 = dma.done.wait [#allocation4], 256  }
 0x14e   :  { %588 = vsyncadd [#allocation4], 4294967040 }
 0x14f   :  { %344 = vsyncpa [#allocation3], 1 }
 0x150   :  { %345 = vsyncpa [#allocation6], 1 }
 0x151   :  { %346 = vsyncpa [#allocation4], 1 }

</bundles_post_ra>
